<compile_context>
chip_gen: v6e
topology: v6e:2x2x1
jax: 0.10.0
libtpu: 0.0.40
codegen_flags: <defaults>
</compile_context>

<pallas_src>
import jax
import jax.numpy as jnp
from jax import lax
from jax.experimental import pallas as pl
from jax.experimental.pallas import tpu as pltpu

ALPHA = 0.5
GAMMA = 1                        # (1 - exp(-BCE)) ** 1
_MAX_TILE_ELEMS = 2048 * 512     # 1M elems -> 4 MiB f32 per input per pipeline buffer
_GRAN = 32                       # row granule: safe sublane tiling for f32/bf16/int8/bool
_MIN_SPLIT_ROWS = 2 * _GRAN      # engage the 2-TensorCore split once both cores have work


def _round_up(x, m):
    return (x + m - 1) // m * m


def _pick_lanes(total):
    """Lane-dense slab width (multiple of 128).  Prefer a width that (a) divides `total`
    (zero-copy reshape, no tail) and (b) leaves enough rows for the tiled path."""
    for lanes in (512, 256, 128):
        if total % lanes == 0 and total // lanes >= _GRAN:
            return lanes
    for lanes in (512, 256, 128):
        if total // lanes >= _GRAN:
            return lanes
    for lanes in (512, 256, 128):
        if total % lanes == 0 and total // lanes >= 1:
            return lanes
    return 128


def _bce_sum_prefix(x2d, t2d, rows, lanes):
    """Sum of elementwise BCE-with-logits over a (rows, lanes) slab via one pallas_call.
    `rows`/`lanes` are static Python ints; targets are cast to f32 on the VMEM tile."""
    max_tile_rows = max(_GRAN, _MAX_TILE_ELEMS // lanes)

    if rows >= _GRAN:
        acc_rows = 8
        n_split = 2 if rows >= _MIN_SPLIT_ROWS else 1
        rows_per_core = pl.cdiv(rows, n_split)
        steps_per_core = pl.cdiv(rows_per_core, max_tile_rows)
        tile_rows = _round_up(pl.cdiv(rows_per_core, steps_per_core), _GRAN)
        strip = next(s for s in (128, 64, 32) if tile_rows % s == 0)
        needs_mask = (n_split * steps_per_core * tile_rows) != rows
    else:
        # Tiny slab (< 32 rows): a single block equal to the full array dims (always legal).
        acc_rows = rows
        n_split = 1
        steps_per_core = 1
        tile_rows = rows
        strip = rows
        needs_mask = False

    n_strips = tile_rows // strip
    fold = strip // acc_rows

    def kernel(x_ref, t_ref, o_ref):
        c = pl.program_id(0)
        i = pl.program_id(1)

        @pl.when(i == 0)
        def _():
            o_ref[...] = jnp.zeros_like(o_ref)

        row0 = (c * steps_per_core + i) * tile_rows   # global row offset of this tile

        def strip_body(k, acc):
            if n_strips == 1:                         # static: whole tile at once
                r = 0
                x = x_ref[...].astype(jnp.float32)
                t = t_ref[...].astype(jnp.float32)
            else:
                r = pl.multiple_of(k * strip, strip)
                x = x_ref[pl.ds(r, strip), :].astype(jnp.float32)
                t = t_ref[pl.ds(r, strip), :].astype(jnp.float32)
            # Numerically-stable BCE with logits (PyTorch formulation):
            #   max(x, 0) - x*t + log1p(exp(-|x|))
            bce = jnp.maximum(x, 0.0) - x * t + jnp.log1p(jnp.exp(-jnp.abs(x)))
            if needs_mask:                            # static: only when grid overhangs rows
                grow = row0 + r + lax.broadcasted_iota(jnp.int32, (strip, lanes), 0)
                bce = jnp.where(grow < rows, bce, 0.0)
            # Fold the strip onto the (acc_rows, lanes) accumulator with vreg-aligned,
            # static-slice VPU adds (no reshape / relayout).
            for s in range(fold):
                acc = acc + bce[s * acc_rows:(s + 1) * acc_rows, :]
            return acc

        acc0 = jnp.zeros((acc_rows, lanes), jnp.float32)
        acc = lax.fori_loop(0, n_strips, strip_body, acc0, unroll=True)
        o_ref[...] += acc

    def in_map(c, i):
        return (c * steps_per_core + i, 0)

    cost = pl.CostEstimate(
        flops=6 * rows * lanes,
        transcendentals=2 * rows * lanes,
        bytes_accessed=int(x2d.size * x2d.dtype.itemsize
                           + t2d.size * t2d.dtype.itemsize),
    )

    partials = pl.pallas_call(
        kernel,
        out_shape=jax.ShapeDtypeStruct((n_split, acc_rows, lanes), jnp.float32),
        grid_spec=pltpu.PrefetchScalarGridSpec(
            num_scalar_prefetch=0,
            grid=(n_split, steps_per_core),
            in_specs=[
                pl.BlockSpec((tile_rows, lanes), in_map),
                pl.BlockSpec((tile_rows, lanes), in_map),
            ],
            out_specs=pl.BlockSpec((None, acc_rows, lanes), lambda c, i: (c, 0, 0)),
        ),
        compiler_params=pltpu.CompilerParams(
            dimension_semantics=("parallel", "arbitrary"),
            vmem_limit_bytes=48 * 1024 * 1024,
        ),
        cost_estimate=cost,
    )(x2d, t2d)

    return jnp.sum(partials)


def focal_loss(inputs, targets):
    """Focal loss (alpha=0.5, gamma=1) matching the PyTorch module.

    inputs:  logits of any shape / float dtype (the flatten(0, 2) is mean-invariant).
    targets: same element count, any dtype; cast to f32 inside the kernel.  Pass
             int8 / bool / bf16 targets to cut HBM traffic (kernel is memory-bound).
    """
    total = inputs.size
    assert targets.size == total, "targets must match the flattened inputs size"

    x_flat = inputs.reshape(-1)
    t_flat = targets.reshape(-1)       # native dtype: upcast happens on the VMEM tile

    lanes = _pick_lanes(total)
    rows = total // lanes              # lane-aligned prefix rows
    tail = total - rows * lanes        # < lanes leftover elements (usually 0)

    # Aligned prefix -> Pallas kernel.  Zero-copy reshape when tail == 0 (common case);
    # otherwise the prefix slice is the rare path and the <512-element tail goes to XLA.
    if rows > 0:
        if tail:
            x2d = x_flat[: rows * lanes].reshape(rows, lanes)
            t2d = t_flat[: rows * lanes].reshape(rows, lanes)
        else:
            x2d = x_flat.reshape(rows, lanes)
            t2d = t_flat.reshape(rows, lanes)
        bce_sum = _bce_sum_prefix(x2d, t2d, rows, lanes)
    else:
        bce_sum = jnp.float32(0.0)

    if tail:
        xt = x_flat[rows * lanes:].astype(jnp.float32)
        tt = t_flat[rows * lanes:].astype(jnp.float32)
        bce_sum = bce_sum + jnp.sum(
            jnp.maximum(xt, 0.0) - xt * tt + jnp.log1p(jnp.exp(-jnp.abs(xt))))

    mean_bce = bce_sum / jnp.float32(total)
    bce_exp = jnp.exp(-mean_bce)
    return ALPHA * (1.0 - bce_exp) ** GAMMA * mean_bce


def _focal_loss_ref(inputs, targets):
    """Pure-JAX reference mirroring the PyTorch module."""
    x = inputs.reshape(-1, inputs.shape[-1]).astype(jnp.float32)   # flatten(0, 2)
    t = targets.astype(jnp.float32)
    bce_elem = jnp.maximum(x, 0.0) - x * t + jnp.log1p(jnp.exp(-jnp.abs(x)))
    bce = jnp.mean(bce_elem)
    return ALPHA * (1.0 - jnp.exp(-bce)) ** GAMMA * bce


if __name__ == "__main__":
    key = jax.random.PRNGKey(0)
    k1, k2 = jax.random.split(key)

    # Small NCHW logits and matching (N*C*H, W) binary targets (narrow int8 dtype).
    N, C, H, W = 2, 4, 32, 32
    inputs = jax.random.normal(k1, (N, C, H, W), dtype=jnp.float32)
    targets = (jax.random.uniform(k2, (N * C * H, W)) > 0.5).astype(jnp.int8)

    loss = jax.block_until_ready(jax.jit(focal_loss)(inputs, targets))
    ref = jax.block_until_ready(_focal_loss_ref(inputs, targets))

    assert jnp.allclose(loss, ref, rtol=1e-5, atol=1e-6), (loss, ref)
    print("KERNEL_OK")
</pallas_src>

<mosaic_0001>
module attributes {stable_mosaic.version = 11 : i64} {
  func.func @kernel(%arg0: i32, %arg1: i32, %arg2: memref<32x256xf32, #tpu.memory_space<vmem>>, %arg3: memref<32x256xi8, #tpu.memory_space<vmem>>, %arg4: memref<1x8x256xf32, #tpu.memory_space<vmem>>) attributes {dimension_semantics = [#tpu.dimension_semantics<parallel>, #tpu.dimension_semantics<arbitrary>], iteration_bounds = array<i64: 1, 1>, scalar_prefetch = 0 : i64, scratch_operands = 0 : i64, tpu.core_type = #tpu.core_type<tc>, window_params = [{transform_indices = @transform_0, window_bounds = array<i64: 32, 256>}, {transform_indices = @transform_1, window_bounds = array<i64: 32, 256>}, {transform_indices = @transform_2, window_bounds = array<i64: 1, 8, 256>}]} {
    %c0_i32 = arith.constant 0 : i32
    %0 = arith.cmpi eq, %arg1, %c0_i32 : i32
    %1 = arith.extui %0 : i1 to i32
    %c0_i32_0 = arith.constant 0 : i32
    %2 = arith.cmpi ne, %1, %c0_i32_0 : i32
    scf.if %2 {
      %cst_13 = arith.constant 0.000000e+00 : f32
      %31 = vector.broadcast %cst_13 : f32 to vector<8x256xf32>
      %c0_14 = arith.constant 0 : index
      %c0_15 = arith.constant 0 : index
      %c0_16 = arith.constant 0 : index
      %32 = vector.load %arg4[%c0_14, %c0_15, %c0_16] : memref<1x8x256xf32, #tpu.memory_space<vmem>>, vector<1x8x256xf32>
      %33 = vector.shape_cast %32 : vector<1x8x256xf32> to vector<8x256xf32>
      %34 = vector.shape_cast %31 : vector<8x256xf32> to vector<1x8x256xf32>
      tpu.vector_store %arg4[%c0_14, %c0_15, %c0_16], %34 {strides = array<i32>} : memref<1x8x256xf32, #tpu.memory_space<vmem>>, vector<1x8x256xf32>,
    } else {
    }
    %cst = arith.constant 0.000000e+00 : f32
    %3 = vector.broadcast %cst : f32 to vector<8x256xf32>
    %c0_i32_1 = arith.constant 0 : i32
    %c0 = arith.constant 0 : index
    %c0_2 = arith.constant 0 : index
    %4 = vector.load %arg2[%c0, %c0_2] : memref<32x256xf32, #tpu.memory_space<vmem>>, vector<32x256xf32>
    %c0_3 = arith.constant 0 : index
    %c0_4 = arith.constant 0 : index
    %5 = vector.load %arg3[%c0_3, %c0_4] : memref<32x256xi8, #tpu.memory_space<vmem>>, vector<32x256xi8>
    %6 = arith.sitofp %5 : vector<32x256xi8> to vector<32x256xf32>
    %cst_5 = arith.constant 0.000000e+00 : f32
    %7 = vector.broadcast %cst_5 : f32 to vector<32x256xf32>
    %8 = arith.maximumf %4, %7 : vector<32x256xf32>
    %9 = arith.mulf %4, %6 : vector<32x256xf32>
    %10 = arith.subf %8, %9 : vector<32x256xf32>
    %11 = math.absf %4 : vector<32x256xf32>
    %cst_6 = arith.constant 0.000000e+00 : f32
    %12 = vector.broadcast %cst_6 : f32 to vector<32x256xf32>
    %13 = arith.subf %12, %11 : vector<32x256xf32>
    %14 = math.exp %13 : vector<32x256xf32>
    %15 = math.log1p %14 : vector<32x256xf32>
    %16 = arith.addf %10, %15 : vector<32x256xf32>
    %17 = vector.extract_strided_slice %16 {offsets = [0, 0], sizes = [8, 256], strides = [1, 1]} : vector<32x256xf32> to vector<8x256xf32>
    %18 = arith.addf %3, %17 : vector<8x256xf32>
    %19 = vector.extract_strided_slice %16 {offsets = [8, 0], sizes = [8, 256], strides = [1, 1]} : vector<32x256xf32> to vector<8x256xf32>
    %20 = arith.addf %18, %19 : vector<8x256xf32>
    %21 = vector.extract_strided_slice %16 {offsets = [16, 0], sizes = [8, 256], strides = [1, 1]} : vector<32x256xf32> to vector<8x256xf32>
    %22 = arith.addf %20, %21 : vector<8x256xf32>
    %23 = vector.extract_strided_slice %16 {offsets = [24, 0], sizes = [8, 256], strides = [1, 1]} : vector<32x256xf32> to vector<8x256xf32>
    %24 = arith.addf %22, %23 : vector<8x256xf32>
    %c0_7 = arith.constant 0 : index
    %c0_8 = arith.constant 0 : index
    %c0_9 = arith.constant 0 : index
    %25 = vector.load %arg4[%c0_7, %c0_8, %c0_9] : memref<1x8x256xf32, #tpu.memory_space<vmem>>, vector<1x8x256xf32>
    %26 = vector.shape_cast %25 : vector<1x8x256xf32> to vector<8x256xf32>
    %27 = arith.addf %26, %24 : vector<8x256xf32>
    %c0_10 = arith.constant 0 : index
    %c0_11 = arith.constant 0 : index
    %c0_12 = arith.constant 0 : index
    %28 = vector.load %arg4[%c0_10, %c0_11, %c0_12] : memref<1x8x256xf32, #tpu.memory_space<vmem>>, vector<1x8x256xf32>
    %29 = vector.shape_cast %28 : vector<1x8x256xf32> to vector<8x256xf32>
    %30 = vector.shape_cast %27 : vector<8x256xf32> to vector<1x8x256xf32>
    tpu.vector_store %arg4[%c0_10, %c0_11, %c0_12], %30 {strides = array<i32>} : memref<1x8x256xf32, #tpu.memory_space<vmem>>, vector<1x8x256xf32>,
    return
  }
  func.func @transform_0(%arg0: i32, %arg1: i32) -> (i32, i32) {
    %c1_i32 = arith.constant 1 : i32
    %0 = arith.muli %arg0, %c1_i32 : i32
    %1 = arith.addi %0, %arg1 : i32
    %c0_i32 = arith.constant 0 : i32
    %c0_i32_0 = arith.constant 0 : i32
    return %1, %c0_i32 : i32, i32
  }
  func.func @transform_1(%arg0: i32, %arg1: i32) -> (i32, i32) {
    %c1_i32 = arith.constant 1 : i32
    %0 = arith.muli %arg0, %c1_i32 : i32
    %1 = arith.addi %0, %arg1 : i32
    %c0_i32 = arith.constant 0 : i32
    %c0_i32_0 = arith.constant 0 : i32
    return %1, %c0_i32 : i32, i32
  }
  func.func @transform_2(%arg0: i32, %arg1: i32) -> (i32, i32, i32) {
    %c0_i32 = arith.constant 0 : i32
    %c0_i32_0 = arith.constant 0 : i32
    %c0_i32_1 = arith.constant 0 : i32
    return %arg0, %c0_i32, %c0_i32_0 : i32, i32, i32
  }
}

</mosaic_0001>

<bundles_post_ra>
// kernel: focal_loss.1
= control target key start
LH: loop header
LB: loop body
LE: loop exit
PB: predicated region body
PF: predicated region fallthrough
CT: control target
= control target key end

     0   :  { %s467_s0 = inlined_call_operand.vmem [shape: f32[32,256], index: 0, kind: input, shape index: {}]   ;;  %s468_s1 = inlined_call_operand.vmem [shape: s8[32,256], index: 1, kind: input, shape index: {}]   ;;  %s469_s2 = inlined_call_operand.vmem [shape: f32[1,8,256], index: 2, kind: output, shape index: {}]  }
   0x1   :  { %v305_v0 = vld [vmem:[%s467_s0] sm:$0xff]  ;;  %v310_v1 = vld [vmem:[%s467_s0 + $0x10] sm:$0xff]  ;;  %v329_v16 = vld [vmem:[%s467_s0 + $0x8] sm:$0xff] }
   0x2   :  { %v315_v2 = vld [vmem:[%s467_s0 + $0x20] sm:$0xff]  ;;  %v320_v3 = vld [vmem:[%s467_s0 + $0x30] sm:$0xff]  ;;  %v112_v4 = vand.u32 2147483647, %v305_v0  ;;  %v114_v5 = vand.u32 2147483647, %v310_v1 }
   0x3   :  { %v116_v6 = vand.u32 2147483647, %v315_v2  ;;  %v118_v7 = vand.u32 2147483647, %v320_v3  ;;  %v334_v17 = vld [vmem:[%s467_s0 + $0x18] sm:$0xff]  ;;  %v339_v18 = vld [vmem:[%s467_s0 + $0x28] sm:$0xff] }
   0x4   :  { %v120_v8 = vsub.f32 0.0, %v112_v4  ;;  %v122_v9 = vsub.f32 0.0, %v114_v5  ;;  %v344_v19 = vld [vmem:[%s467_s0 + $0x38] sm:$0xff]  ;;  %v113_v20 = vand.u32 2147483647, %v329_v16  ;;  %v70_v22 = vld [vmem:[%s468_s1] sm:$0xff] }
   0x5   :  { %v124_v10 = vsub.f32 0.0, %v116_v6  ;;  %v126_v11 = vsub.f32 0.0, %v118_v7  ;;  %v115_v21 = vand.u32 2147483647, %v334_v17  ;;  %v117_v23 = vand.u32 2147483647, %v339_v18 }
   0x6   :  { %v128_v12 = vmul.f32 1.442695, %v120_v8  ;;  %v132_v13 = vmul.f32 1.442695, %v122_v9  ;;  %v119_v24 = vand.u32 2147483647, %v344_v19  ;;  %v72_v30 = vunpack.c.0.s8 %v70_v22 }
   0x7   :  { %v136_v14 = vmul.f32 1.442695, %v124_v10  ;;  %v140_v15 = vmul.f32 1.442695, %v126_v11  ;;  %v121_v25 = vsub.f32 0.0, %v113_v20  ;;  %v123_v26 = vsub.f32 0.0, %v115_v21 }
   0x8   :  { %255 = vpow2.f32 %v128_v12  ;;  %v125_v27 = vsub.f32 0.0, %v117_v23  ;;  %v127_v28 = vsub.f32 0.0, %v119_v24  ;;  %v74_v31 = vunpack.c.1.s8 %v70_v22  ;;  %v71_v51 = vld [vmem:[%s468_s1 + $0x8] sm:$0xff] }
   0x9   :  { %257 = vpow2.f32 %v132_v13  ;;  %v130_v29 = vmul.f32 1.442695, %v121_v25  ;;  %v76_v32 = vunpack.c.2.s8 %v70_v22  ;;  %v134_v33 = vmul.f32 1.442695, %v123_v26 }
   0xa   :  { %259 = vpow2.f32 %v136_v14  ;;  %v78_v34 = vunpack.c.3.s8 %v70_v22  ;;  %v138_v35 = vmul.f32 1.442695, %v125_v27  ;;  %v142_v36 = vmul.f32 1.442695, %v127_v28 }
   0xb   :  { %261 = vpow2.f32 %v140_v15  ;;  %v80_v38 = vcvt.s32.f32 %v72_v30  ;;  %v82_v39 = vcvt.s32.f32 %v74_v31  ;;  %v84_v41 = vcvt.s32.f32 %v76_v32 }
   0xc   :  { %263 = vpow2.f32 %v130_v29  ;;  %v86_v42 = vcvt.s32.f32 %v78_v34  ;;  %v88_v45 = vmax.f32 %v305_v0, 0.0  ;;  %v90_v48 = vmax.f32 %v310_v1, 0.0 }
   0xd   :  { %265 = vpow2.f32 %v134_v33  ;;  %v92_v49 = vmax.f32 %v315_v2, 0.0  ;;  %v94_v52 = vmax.f32 %v320_v3, 0.0  ;;  %v96_v53 = vmul.f32 %v80_v38, %v305_v0 }
   0xe   :  { %267 = vpow2.f32 %v138_v35  ;;  %v98_v54 = vmul.f32 %v82_v39, %v310_v1  ;;  %v100_v55 = vmul.f32 %v84_v41, %v315_v2  ;;  %v102_v56 = vmul.f32 %v86_v42, %v320_v3 }
   0xf   :  { %269 = vpow2.f32 %v142_v36  ;;  %v73_v58 = vunpack.c.0.s8 %v71_v51  ;;  %v75_v59 = vunpack.c.1.s8 %v71_v51  ;;  %v77_v61 = vunpack.c.2.s8 %v71_v51 }
  0x10   :  { %v104_v62 = vsub.f32 %v88_v45, %v96_v53  ;;  %v79_v0 = vunpack.c.3.s8 %v71_v51  ;;  %v106_v4 = vsub.f32 %v90_v48, %v98_v54  ;;  %v108_v1 = vsub.f32 %v92_v49, %v100_v55 }
  0x11   :  { %v378_v5 = vsub.f32 %v94_v52, %v102_v56  ;;  %v81_v6 = vcvt.s32.f32 %v73_v58  ;;  %v83_v7 = vcvt.s32.f32 %v75_v59  ;;  %v89_v8 = vmax.f32 %v329_v16, 0.0 }
  0x12   :  { %v91_v9 = vmax.f32 %v334_v17, 0.0  ;;  %v85_v13 = vcvt.s32.f32 %v77_v61  ;;  %v87_v22 = vcvt.s32.f32 %v79_v0  ;;  %v93_v29 = vmax.f32 %v339_v18, 0.0 }
  0x13   :  { %v95_v30 = vmax.f32 %v344_v19, 0.0 }
  0x15   :  { %v353_v37 = vpop.eup %255 }
  0x16   :  { %v355_v40 = vpop.eup %257  ;;  %v144_v43 = vadd.f32 1.0, %v353_v37  ;;  %v147_v60 = vmul.f32 -0.5, %v353_v37  ;;  %v150_v20 = vand.u32 2147483647, %v353_v37 }
  0x17   :  { %v358_v44 = vpop.eup %259  ;;  %v162_v46 = vadd.f32 1.0, %v355_v40  ;;  %v165_v63 = vmul.f32 -0.5, %v355_v40  ;;  %v168_v25 = vand.u32 2147483647, %v355_v40 }
  0x18   :  { %v362_v47 = vpop.eup %261  ;;  %271 = vlog2.f32 %v144_v43  ;;  %v180_v50 = vadd.f32 1.0, %v358_v44  ;;  %v183_v2 = vmul.f32 -0.5, %v358_v44  ;;  %v148_v11 = vadd.f32 1.0, %v147_v60 }
  0x19   :  { %273 = vlog2.f32 %v162_v46  ;;  %v198_v57 = vadd.f32 1.0, %v362_v47  ;;  %v381_v3 = vpop.eup %263  ;;  %v201_v12 = vmul.f32 -0.5, %v362_v47  ;;  %v166_v21 = vadd.f32 1.0, %v165_v63 }
  0x1a   :  { %275 = vlog2.f32 %v180_v50  ;;  %v385_v10 = vpop.eup %265  ;;  %v153_v14 = vadd.f32 1.0, %v381_v3  ;;  %v184_v26 = vadd.f32 1.0, %v183_v2  ;;  %v186_v28 = vand.u32 2147483647, %v358_v44 }
  0x1b   :  { %277 = vlog2.f32 %v198_v57  ;;  %v389_v15 = vpop.eup %267  ;;  %v171_v23 = vadd.f32 1.0, %v385_v10  ;;  %v149_v31 = vmul.f32 %v353_v37, %v148_v11  ;;  %v202_v32 = vadd.f32 1.0, %v201_v12 }
  0x1c   :  { %v393_v24 = vpop.eup %269  ;;  %279 = vlog2.f32 %v153_v14  ;;  %v189_v27 = vadd.f32 1.0, %v389_v15  ;;  %vm402_vm0 = vcmp.lt.f32.partialorder %v150_v20, 0.0004427343  ;;  %v167_v36 = vmul.f32 %v355_v40, %v166_v21 }
  0x1d   :  { %281 = vlog2.f32 %v171_v23  ;;  %v207_v33 = vadd.f32 1.0, %v393_v24  ;;  %v204_v38 = vand.u32 2147483647, %v362_v47  ;;  %v156_v39 = vmul.f32 -0.5, %v381_v3 }
  0x1e   :  { %283 = vlog2.f32 %v189_v27  ;;  %vm409_vm1 = vcmp.lt.f32.partialorder %v168_v25, 0.0004427343  ;;  %v185_v37 = vmul.f32 %v358_v44, %v184_v26  ;;  %vm414_vm2 = vcmp.lt.f32.partialorder %v186_v28, 0.0004427343 }
  0x1f   :  { %285 = vlog2.f32 %v207_v33  ;;  %v97_v40 = vmul.f32 %v81_v6, %v329_v16  ;;  %v174_v49 = vmul.f32 -0.5, %v385_v10  ;;  %v203_v52 = vmul.f32 %v362_v47, %v202_v32 }
  0x20   :  { %v192_v53 = vmul.f32 -0.5, %v389_v15  ;;  %vm205_vm3 = vcmp.lt.f32.partialorder %v204_v38, 0.0004427343  ;;  %v157_v56 = vadd.f32 1.0, %v156_v39  ;;  %v210_v60 = vmul.f32 -0.5, %v393_v24 }
  0x21   :  { %v99_v63 = vmul.f32 %v83_v7, %v334_v17  ;;  %v159_v47 = vand.u32 2147483647, %v381_v3  ;;  %v175_v0 = vadd.f32 1.0, %v174_v49  ;;  %v177_v11 = vand.u32 2147483647, %v385_v10 }
  0x22   :  { %v193_v12 = vadd.f32 1.0, %v192_v53  ;;  %v101_v14 = vmul.f32 %v85_v13, %v339_v18  ;;  %v103_v20 = vmul.f32 %v87_v22, %v344_v19  ;;  %v158_v7 = vmul.f32 %v381_v3, %v157_v56 }
  0x23   :  { %v211_v23 = vadd.f32 1.0, %v210_v60  ;;  %v107_v26 = vsub.f32 %v91_v9, %v99_v63  ;;  %vm441_vm4 = vcmp.lt.f32.partialorder %v159_v47, 0.0004427343  ;;  %v213_v13 = vand.u32 2147483647, %v393_v24 }
  0x24   :  { %vm447_vm5 = vcmp.lt.f32.partialorder %v177_v11, 0.0004427343  ;;  %v194_v3 = vmul.f32 %v389_v15, %v193_v12  ;;  %v109_v17 = vsub.f32 %v93_v29, %v101_v14  ;;  %v111_v35 = vsub.f32 %v95_v30, %v103_v20 }
  0x25   :  { %v272_v34 = vpop.eup %271  ;;  %v212_v33 = vmul.f32 %v393_v24, %v211_v23  ;;  %vm214_vm7 = vcmp.lt.f32.partialorder %v213_v13, 0.0004427343 }
  0x26   :  { %v274_v41 = vpop.eup %273  ;;  %v146_v42 = vmul.f32 0.6931472, %v272_v34 }
  0x27   :  { %v276_v45 = vpop.eup %275  ;;  %v164_v46 = vmul.f32 0.6931472, %v274_v41 }
  0x28   :  { %v152_v50 = vsel %vm402_vm0, %v149_v31, %v146_v42  ;;  %v182_v51 = vmul.f32 0.6931472, %v276_v45  ;;  %v278_v44 = vpop.eup %277 }
  0x29   :  { %v170_v54 = vsel %vm409_vm1, %v167_v36, %v164_v46  ;;  %v216_v55 = vadd.f32 %v152_v50, %v104_v62  ;;  %v200_v58 = vmul.f32 0.6931472, %v278_v44  ;;  %v280_v25 = vpop.eup %279 }
  0x2a   :  { %v188_v57 = vsel %vm414_vm2, %v185_v37, %v182_v51  ;;  %v218_v59 = vadd.f32 %v170_v54, %v106_v4  ;;  %v195_v4 = vand.u32 2147483647, %v389_v15  ;;  %v282_v22 = vpop.eup %281  ;;  %v155_v31 = vmul.f32 0.6931472, %v280_v25 }
  0x2b   :  { %v220_v61 = vadd.f32 %v188_v57, %v108_v1  ;;  %v206_v2 = vsel %vm205_vm3, %v203_v52, %v200_v58  ;;  %v105_v1 = vsub.f32 %v89_v8, %v97_v40  ;;  %v284_v8 = vpop.eup %283  ;;  %v173_v9 = vmul.f32 0.6931472, %v282_v22 }
  0x2c   :  { %v226_v6 = vadd.f32 %v218_v59, %v216_v55  ;;  %v222_v62 = vadd.f32 %v206_v2, %v378_v5  ;;  %v176_v5 = vmul.f32 %v385_v10, %v175_v0  ;;  %vm196_vm6 = vcmp.lt.f32.partialorder %v195_v4, 0.0004427343  ;;  %v286_v34 = vpop.eup %285 }
  0x2d   :  { %v161_v10 = vsel %vm441_vm4, %v158_v7, %v155_v31  ;;  %v191_v32 = vmul.f32 0.6931472, %v284_v8  ;;  %v209_v29 = vmul.f32 0.6931472, %v286_v34 }
  0x2e   :  { %v228_v21 = vadd.f32 %v226_v6, %v220_v61  ;;  %v179_v36 = vsel %vm447_vm5, %v176_v5, %v173_v9  ;;  %v217_v15 = vadd.f32 %v161_v10, %v105_v1 }
  0x2f   :  { %v197_v18 = vsel %vm196_vm6, %v194_v3, %v191_v32  ;;  %v219_v38 = vadd.f32 %v179_v36, %v107_v26  ;;  %v215_v41 = vsel %vm214_vm7, %v212_v33, %v209_v29 }
  0x30   :  { %v230_v28 = vadd.f32 %v228_v21, %v222_v62  ;;  %v221_v39 = vadd.f32 %v197_v18, %v109_v17  ;;  %v223_v24 = vadd.f32 %v215_v41, %v111_v35 }
  0x31   :  { %v227_v42 = vadd.f32 %v219_v38, %v217_v15 }
  0x32   :  { %236 = vst [vmem:[%s469_s2] sm:$0xff] %v230_v28 }
  0x33   :  { %v229_v43 = vadd.f32 %v227_v42, %v221_v39 }
  0x35   :  { %v231_v37 = vadd.f32 %v229_v43, %v223_v24 }
  0x37   :  { %237 = vst [vmem:[%s469_s2 + $0x8] sm:$0xff] %v231_v37 }

</bundles_post_ra>
